<compile_context>
chip_gen: v6e
topology: v6e:2x2x1
jax: 0.10.0
libtpu: 0.0.40
codegen_flags: <defaults>
</compile_context>

<pallas_src>
import functools

import jax
import jax.numpy as jnp
from jax.experimental import pallas as pl
from jax.experimental.pallas import tpu as pltpu

HIDDEN = 50          # hidden_size in the PyTorch module
HIDDEN2 = 2 * HIDDEN

LANE = 128
SUBLANE = 8


def _round_up(x, m):
    return ((x + m - 1) // m) * m


def _attention_kernel(dh_ref, wt_ref, b_ref, enc_ref, out_ref, attw_ref, *,
                      seq_len):
    # dh_ref:   (TILE_B, H)        decoder hidden block
    # wt_ref:   (H, 2H)            W weight, pre-transposed (PyTorch stores (2H, H))
    # b_ref:    (1, 2H)            W bias
    # enc_ref:  (TILE_B, S, 2H)    encoder outputs block (natural S / 2H sizes)
    # out_ref:  (TILE_B, 2H)       context vectors
    # attw_ref: (TILE_B, S)        attention weights
    f32 = jnp.float32

    # nn.Linear: one MXU matmul for the whole batch block, f32 accumulation.
    proj = (jnp.dot(dh_ref[...].astype(f32), wt_ref[...].astype(f32),
                    preferred_element_type=f32)
            + b_ref[...].astype(f32))                                   # (TILE_B, 2H)

    # scores[:, s] = sum_d proj[:, d] * enc[:, s, d]
    # Statically unrolled over the tiny sequence axis; every intermediate is
    # bounded to (TILE_B, 2H) — no 3-D broadcast temporary to spill.
    cols = []
    for s in range(seq_len):
        e_s = enc_ref[:, s, :].astype(f32)                              # (TILE_B, 2H)
        cols.append(jnp.sum(proj * e_s, axis=-1, keepdims=True))        # (TILE_B, 1)
    scores = jnp.concatenate(cols, axis=-1)                             # (TILE_B, S)

    # Softmax over the sequence axis (no padded positions -> no masking).
    m = jnp.max(scores, axis=-1, keepdims=True)
    e = jnp.exp(scores - m)
    p = e * pl.reciprocal(jnp.sum(e, axis=-1, keepdims=True), approx=True)

    attw_ref[...] = p.astype(attw_ref.dtype)   # tiny (TILE_B, S) store

    # ctx[:, d] = sum_s p[:, s] * enc[:, s, d], same bounded-intermediate loop.
    ctx = jnp.zeros(proj.shape, f32)
    for s in range(seq_len):
        e_s = enc_ref[:, s, :].astype(f32)
        ctx = ctx + p[:, s:s + 1] * e_s
    out_ref[...] = ctx.astype(out_ref.dtype)


def attention_forward(decoder_hidden, encoder_output, w_weight, w_bias,
                      stream_dtype=None):
    """decoder_hidden: (B, H), encoder_output: (B, S, 2H),
       w_weight: (2H, H) [PyTorch Linear layout], w_bias: (2H,).
       Returns (output (B, 2H), attention_result (B, 1, S)).

       stream_dtype: optionally stream dh/enc through HBM as a narrower dtype
       (e.g. jnp.bfloat16 on v6e/v7x); the kernel upcasts to f32 after load so
       all math stays in f32 (also keeps v5e on its fast VPU/EUP path)."""
    B, H = decoder_hidden.shape
    _, S, H2 = encoder_output.shape
    assert H2 == 2 * H

    if stream_dtype is not None:
        decoder_hidden = decoder_hidden.astype(stream_dtype)
        encoder_output = encoder_output.astype(stream_dtype)
    out_dtype = jnp.float32

    # --- VMEM-aware batch-tile sizing (chip-derived budget, real accounting) ---
    try:
        vmem_cap = int(getattr(pltpu.get_tpu_info(), "vmem_capacity_bytes",
                               64 * 1024 * 1024))
    except Exception:  # pragma: no cover - query unavailable
        vmem_cap = 64 * 1024 * 1024               # conservative (v7x = 64 MiB)
    vmem_budget = min(vmem_cap // 4, 24 * 1024 * 1024)

    in_bytes = jnp.dtype(decoder_hidden.dtype).itemsize
    f_lanes = _round_up(H2, LANE)                 # lane-layout width of features
    h_lanes = _round_up(H, LANE)
    s_sub = _round_up(S, SUBLANE)                 # sublane-layout depth of enc
    s_lanes = _round_up(S, LANE)                  # lane-layout width of attw
    per_row = (2 * s_sub * f_lanes * in_bytes     # enc double-buffer
               + 2 * h_lanes * in_bytes           # dh double-buffer
               + 2 * f_lanes * 4                  # ctx out double-buffer
               + 2 * s_lanes * 4                  # attw out double-buffer
               + 6 * f_lanes * 4)                 # in-kernel f32 temporaries
    fixed = 2 * (_round_up(H, SUBLANE) * f_lanes + f_lanes) * 4 + (1 << 20)
    max_tile = max(SUBLANE,
                   (((vmem_budget - fixed) // per_row) // SUBLANE) * SUBLANE)
    TILE_B = min(512, _round_up(B, SUBLANE), max_tile)
    # v7x has 2 TensorCores: keep >=2 steps on the parallel axis when possible.
    if _round_up(B, TILE_B) // TILE_B < 2 and TILE_B > SUBLANE:
        TILE_B = max(SUBLANE, _round_up(TILE_B // 2, SUBLANE))
    B_pad = _round_up(B, TILE_B)
    vmem_limit = int(min(vmem_cap // 2, 2 * vmem_budget))

    # Only the batch axis is padded; padded rows produce a harmless uniform
    # softmax and are sliced off below.
    dh_p = decoder_hidden if B_pad == B else jnp.pad(
        decoder_hidden, ((0, B_pad - B), (0, 0)))
    enc_p = encoder_output if B_pad == B else jnp.pad(
        encoder_output, ((0, B_pad - B), (0, 0), (0, 0)))
    # TODO(synk): in a real model, hoist the weight transpose out of the
    # per-call path (precompute once next to the parameters).
    wt = w_weight.T                               # (H, 2H)
    bias = w_bias.reshape(1, H2)

    kernel = functools.partial(_attention_kernel, seq_len=S)

    out_p, attw_p = pl.pallas_call(
        kernel,
        out_shape=(
            jax.ShapeDtypeStruct((B_pad, H2), out_dtype),
            jax.ShapeDtypeStruct((B_pad, S), out_dtype),
        ),
        grid_spec=pltpu.PrefetchScalarGridSpec(
            num_scalar_prefetch=0,
            grid=(B_pad // TILE_B,),
            in_specs=[
                pl.BlockSpec((TILE_B, H), lambda i: (i, 0)),          # decoder_hidden
                pl.BlockSpec((H, H2), lambda i: (0, 0)),              # W^T
                pl.BlockSpec((1, H2), lambda i: (0, 0)),              # bias
                pl.BlockSpec((TILE_B, S, H2), lambda i: (i, 0, 0)),   # encoder_output
            ],
            out_specs=[
                pl.BlockSpec((TILE_B, H2), lambda i: (i, 0)),         # context
                pl.BlockSpec((TILE_B, S), lambda i: (i, 0)),          # attention weights
            ],
        ),
        compiler_params=pltpu.CompilerParams(
            dimension_semantics=("parallel",),
            vmem_limit_bytes=vmem_limit),
    )(dh_p, wt, bias, enc_p)

    out = out_p[:B]                        # (B, 2H)
    attw = attw_p[:B, None, :]             # (B, 1, S)
    return out, attw


def _reference(decoder_hidden, encoder_output, w_weight, w_bias):
    # Plain-JAX mirror of the PyTorch forward for verification.
    dh = decoder_hidden[:, None, :]                        # (B, 1, H)
    proj = dh @ w_weight.T + w_bias                        # (B, 1, 2H)
    scores = proj @ jnp.swapaxes(encoder_output, 1, 2)     # (B, 1, S)
    attn = jax.nn.softmax(scores, axis=-1)                 # (B, 1, S)
    out = (attn @ encoder_output)[:, 0, :]                 # (B, 2H)
    return out, attn


if __name__ == "__main__":
    key = jax.random.PRNGKey(0)
    k_dh, k_enc, k_w, k_b, k_w2, k_b2 = jax.random.split(key, 6)

    B, S = 2, 8

    decoder_hidden = jax.random.normal(k_dh, (B, HIDDEN), dtype=jnp.float32)
    encoder_output = jax.random.normal(k_enc, (B, S, HIDDEN2), dtype=jnp.float32)

    # nn.Linear(hidden_size, hidden_size*2): weight (100, 50), bias (100,)
    bound = 1.0 / (HIDDEN ** 0.5)
    w_weight = jax.random.uniform(k_w, (HIDDEN2, HIDDEN), jnp.float32, -bound, bound)
    w_bias = jax.random.uniform(k_b, (HIDDEN2,), jnp.float32, -bound, bound)

    # self.attention_wight is defined in __init__ but unused in forward();
    # created here only for parameter-shape fidelity.
    _unused_w = jax.random.uniform(k_w2, (HIDDEN2, HIDDEN), jnp.float32, -bound, bound)
    _unused_b = jax.random.uniform(k_b2, (HIDDEN2,), jnp.float32, -bound, bound)

    out, attw = attention_forward(decoder_hidden, encoder_output, w_weight, w_bias)
    out = jax.block_until_ready(out)
    attw = jax.block_until_ready(attw)

    ref_out, ref_attw = _reference(decoder_hidden, encoder_output, w_weight, w_bias)
    assert out.shape == (B, HIDDEN2) and attw.shape == (B, 1, S)
    # approx=True softmax reciprocal (EUP) -> slightly looser tolerance than exact.
    assert jnp.allclose(out, ref_out, atol=2e-3, rtol=2e-3)
    assert jnp.allclose(attw, ref_attw, atol=2e-3, rtol=2e-3)

    print("KERNEL_OK")
</pallas_src>

<mosaic_0001>
module attributes {stable_mosaic.version = 11 : i64} {
  func.func @_attention_kernel(%arg0: i32, %arg1: memref<8x50xf32, #tpu.memory_space<vmem>>, %arg2: memref<50x100xf32, #tpu.memory_space<vmem>>, %arg3: memref<1x100xf32, #tpu.memory_space<vmem>>, %arg4: memref<8x8x100xf32, #tpu.memory_space<vmem>>, %arg5: memref<8x100xf32, #tpu.memory_space<vmem>>, %arg6: memref<8x8xf32, #tpu.memory_space<vmem>>) attributes {dimension_semantics = [#tpu.dimension_semantics<parallel>], iteration_bounds = array<i64: 1>, scalar_prefetch = 0 : i64, scratch_operands = 0 : i64, tpu.core_type = #tpu.core_type<tc>, window_params = [{transform_indices = @transform_0, window_bounds = array<i64: 8, 50>}, {pipeline_mode = #tpu.pipeline_mode<synchronous>, transform_indices = @transform_1, window_bounds = array<i64: 50, 100>}, {pipeline_mode = #tpu.pipeline_mode<synchronous>, transform_indices = @transform_2, window_bounds = array<i64: 1, 100>}, {transform_indices = @transform_3, window_bounds = array<i64: 8, 8, 100>}, {transform_indices = @transform_4, window_bounds = array<i64: 8, 100>}, {transform_indices = @transform_5, window_bounds = array<i64: 8, 8>}]} {
    %c0 = arith.constant 0 : index
    %c0_0 = arith.constant 0 : index
    %0 = vector.load %arg1[%c0, %c0_0] : memref<8x50xf32, #tpu.memory_space<vmem>>, vector<8x50xf32>
    %c0_1 = arith.constant 0 : index
    %c0_2 = arith.constant 0 : index
    %1 = vector.load %arg2[%c0_1, %c0_2] : memref<50x100xf32, #tpu.memory_space<vmem>>, vector<50x100xf32>
    %cst = arith.constant dense<0.000000e+00> : vector<8x100xf32>
    %2 = tpu.matmul %0, %1, %cst {dimension_numbers = #tpu.dot_dimension_numbers<[1], [0], [0], [1], [0, 0, 1, 1], [], []>} : vector<8x50xf32>, vector<50x100xf32>, vector<8x100xf32> -> vector<8x100xf32>
    %c0_3 = arith.constant 0 : index
    %c0_4 = arith.constant 0 : index
    %3 = vector.load %arg3[%c0_3, %c0_4] : memref<1x100xf32, #tpu.memory_space<vmem>>, vector<1x100xf32>
    %4 = vector.broadcast %3 : vector<1x100xf32> to vector<8x100xf32>
    %5 = arith.addf %2, %4 : vector<8x100xf32>
    %c0_5 = arith.constant 0 : index
    %c0_6 = arith.constant 0 : index
    %c0_7 = arith.constant 0 : index
    %6 = vector.load %arg4[%c0_5, %c0_6, %c0_7] : memref<8x8x100xf32, #tpu.memory_space<vmem>>, vector<8x1x100xf32>
    %7 = vector.shape_cast %6 : vector<8x1x100xf32> to vector<8x100xf32>
    %8 = arith.mulf %5, %7 : vector<8x100xf32>
    %cst_8 = arith.constant dense<0.000000e+00> : vector<8xf32>
    %9 = vector.multi_reduction <add>, %8, %cst_8 [1] : vector<8x100xf32> to vector<8xf32>
    %10 = vector.shape_cast %9 : vector<8xf32> to vector<8x1xf32>
    %c0_9 = arith.constant 0 : index
    %c1 = arith.constant 1 : index
    %c0_10 = arith.constant 0 : index
    %11 = vector.load %arg4[%c0_9, %c1, %c0_10] : memref<8x8x100xf32, #tpu.memory_space<vmem>>, vector<8x1x100xf32>
    %12 = vector.shape_cast %11 : vector<8x1x100xf32> to vector<8x100xf32>
    %13 = arith.mulf %5, %12 : vector<8x100xf32>
    %cst_11 = arith.constant dense<0.000000e+00> : vector<8xf32>
    %14 = vector.multi_reduction <add>, %13, %cst_11 [1] : vector<8x100xf32> to vector<8xf32>
    %15 = vector.shape_cast %14 : vector<8xf32> to vector<8x1xf32>
    %c0_12 = arith.constant 0 : index
    %c2 = arith.constant 2 : index
    %c0_13 = arith.constant 0 : index
    %16 = vector.load %arg4[%c0_12, %c2, %c0_13] : memref<8x8x100xf32, #tpu.memory_space<vmem>>, vector<8x1x100xf32>
    %17 = vector.shape_cast %16 : vector<8x1x100xf32> to vector<8x100xf32>
    %18 = arith.mulf %5, %17 : vector<8x100xf32>
    %cst_14 = arith.constant dense<0.000000e+00> : vector<8xf32>
    %19 = vector.multi_reduction <add>, %18, %cst_14 [1] : vector<8x100xf32> to vector<8xf32>
    %20 = vector.shape_cast %19 : vector<8xf32> to vector<8x1xf32>
    %c0_15 = arith.constant 0 : index
    %c3 = arith.constant 3 : index
    %c0_16 = arith.constant 0 : index
    %21 = vector.load %arg4[%c0_15, %c3, %c0_16] : memref<8x8x100xf32, #tpu.memory_space<vmem>>, vector<8x1x100xf32>
    %22 = vector.shape_cast %21 : vector<8x1x100xf32> to vector<8x100xf32>
    %23 = arith.mulf %5, %22 : vector<8x100xf32>
    %cst_17 = arith.constant dense<0.000000e+00> : vector<8xf32>
    %24 = vector.multi_reduction <add>, %23, %cst_17 [1] : vector<8x100xf32> to vector<8xf32>
    %25 = vector.shape_cast %24 : vector<8xf32> to vector<8x1xf32>
    %c0_18 = arith.constant 0 : index
    %c4 = arith.constant 4 : index
    %c0_19 = arith.constant 0 : index
    %26 = vector.load %arg4[%c0_18, %c4, %c0_19] : memref<8x8x100xf32, #tpu.memory_space<vmem>>, vector<8x1x100xf32>
    %27 = vector.shape_cast %26 : vector<8x1x100xf32> to vector<8x100xf32>
    %28 = arith.mulf %5, %27 : vector<8x100xf32>
    %cst_20 = arith.constant dense<0.000000e+00> : vector<8xf32>
    %29 = vector.multi_reduction <add>, %28, %cst_20 [1] : vector<8x100xf32> to vector<8xf32>
    %30 = vector.shape_cast %29 : vector<8xf32> to vector<8x1xf32>
    %c0_21 = arith.constant 0 : index
    %c5 = arith.constant 5 : index
    %c0_22 = arith.constant 0 : index
    %31 = vector.load %arg4[%c0_21, %c5, %c0_22] : memref<8x8x100xf32, #tpu.memory_space<vmem>>, vector<8x1x100xf32>
    %32 = vector.shape_cast %31 : vector<8x1x100xf32> to vector<8x100xf32>
    %33 = arith.mulf %5, %32 : vector<8x100xf32>
    %cst_23 = arith.constant dense<0.000000e+00> : vector<8xf32>
    %34 = vector.multi_reduction <add>, %33, %cst_23 [1] : vector<8x100xf32> to vector<8xf32>
    %35 = vector.shape_cast %34 : vector<8xf32> to vector<8x1xf32>
    %c0_24 = arith.constant 0 : index
    %c6 = arith.constant 6 : index
    %c0_25 = arith.constant 0 : index
    %36 = vector.load %arg4[%c0_24, %c6, %c0_25] : memref<8x8x100xf32, #tpu.memory_space<vmem>>, vector<8x1x100xf32>
    %37 = vector.shape_cast %36 : vector<8x1x100xf32> to vector<8x100xf32>
    %38 = arith.mulf %5, %37 : vector<8x100xf32>
    %cst_26 = arith.constant dense<0.000000e+00> : vector<8xf32>
    %39 = vector.multi_reduction <add>, %38, %cst_26 [1] : vector<8x100xf32> to vector<8xf32>
    %40 = vector.shape_cast %39 : vector<8xf32> to vector<8x1xf32>
    %c0_27 = arith.constant 0 : index
    %c7 = arith.constant 7 : index
    %c0_28 = arith.constant 0 : index
    %41 = vector.load %arg4[%c0_27, %c7, %c0_28] : memref<8x8x100xf32, #tpu.memory_space<vmem>>, vector<8x1x100xf32>
    %42 = vector.shape_cast %41 : vector<8x1x100xf32> to vector<8x100xf32>
    %43 = arith.mulf %5, %42 : vector<8x100xf32>
    %cst_29 = arith.constant dense<0.000000e+00> : vector<8xf32>
    %44 = vector.multi_reduction <add>, %43, %cst_29 [1] : vector<8x100xf32> to vector<8xf32>
    %45 = vector.shape_cast %44 : vector<8xf32> to vector<8x1xf32>
    %46 = tpu.concatenate %10, %15, %20, %25, %30, %35, %40, %45 in 1 : vector<8x1xf32>, vector<8x1xf32>, vector<8x1xf32>, vector<8x1xf32>, vector<8x1xf32>, vector<8x1xf32>, vector<8x1xf32>, vector<8x1xf32> -> vector<8x8xf32>
    %cst_30 = arith.constant dense<0xFF800000> : vector<8xf32>
    %47 = vector.multi_reduction <maximumf>, %46, %cst_30 [1] : vector<8x8xf32> to vector<8xf32>
    %48 = vector.shape_cast %47 : vector<8xf32> to vector<8x1xf32>
    %49 = vector.broadcast %48 : vector<8x1xf32> to vector<8x8xf32>
    %50 = arith.subf %46, %49 : vector<8x8xf32>
    %51 = math.exp %50 : vector<8x8xf32>
    %cst_31 = arith.constant dense<0.000000e+00> : vector<8xf32>
    %52 = vector.multi_reduction <add>, %51, %cst_31 [1] : vector<8x8xf32> to vector<8xf32>
    %53 = vector.shape_cast %52 : vector<8xf32> to vector<8x1xf32>
    %54 = tpu.reciprocal %53 {approx = true} : vector<8x1xf32> -> vector<8x1xf32>
    %55 = vector.broadcast %54 : vector<8x1xf32> to vector<8x8xf32>
    %56 = arith.mulf %51, %55 : vector<8x8xf32>
    %c0_32 = arith.constant 0 : index
    %c0_33 = arith.constant 0 : index
    %57 = vector.load %arg6[%c0_32, %c0_33] : memref<8x8xf32, #tpu.memory_space<vmem>>, vector<8x8xf32>
    tpu.vector_store %arg6[%c0_32, %c0_33], %56 {strides = array<i32>} : memref<8x8xf32, #tpu.memory_space<vmem>>, vector<8x8xf32>,
    %cst_34 = arith.constant 0.000000e+00 : f32
    %58 = vector.broadcast %cst_34 : f32 to vector<8x100xf32>
    %c0_35 = arith.constant 0 : index
    %c0_36 = arith.constant 0 : index
    %c0_37 = arith.constant 0 : index
    %59 = vector.load %arg4[%c0_35, %c0_36, %c0_37] : memref<8x8x100xf32, #tpu.memory_space<vmem>>, vector<8x1x100xf32>
    %60 = vector.shape_cast %59 : vector<8x1x100xf32> to vector<8x100xf32>
    %61 = vector.extract_strided_slice %56 {offsets = [0, 0], sizes = [8, 1], strides = [1, 1]} : vector<8x8xf32> to vector<8x1xf32>
    %62 = vector.broadcast %61 : vector<8x1xf32> to vector<8x100xf32>
    %63 = arith.mulf %62, %60 : vector<8x100xf32>
    %64 = arith.addf %58, %63 : vector<8x100xf32>
    %c0_38 = arith.constant 0 : index
    %c1_39 = arith.constant 1 : index
    %c0_40 = arith.constant 0 : index
    %65 = vector.load %arg4[%c0_38, %c1_39, %c0_40] : memref<8x8x100xf32, #tpu.memory_space<vmem>>, vector<8x1x100xf32>
    %66 = vector.shape_cast %65 : vector<8x1x100xf32> to vector<8x100xf32>
    %67 = vector.extract_strided_slice %56 {offsets = [0, 1], sizes = [8, 1], strides = [1, 1]} : vector<8x8xf32> to vector<8x1xf32>
    %68 = vector.broadcast %67 : vector<8x1xf32> to vector<8x100xf32>
    %69 = arith.mulf %68, %66 : vector<8x100xf32>
    %70 = arith.addf %64, %69 : vector<8x100xf32>
    %c0_41 = arith.constant 0 : index
    %c2_42 = arith.constant 2 : index
    %c0_43 = arith.constant 0 : index
    %71 = vector.load %arg4[%c0_41, %c2_42, %c0_43] : memref<8x8x100xf32, #tpu.memory_space<vmem>>, vector<8x1x100xf32>
    %72 = vector.shape_cast %71 : vector<8x1x100xf32> to vector<8x100xf32>
    %73 = vector.extract_strided_slice %56 {offsets = [0, 2], sizes = [8, 1], strides = [1, 1]} : vector<8x8xf32> to vector<8x1xf32>
    %74 = vector.broadcast %73 : vector<8x1xf32> to vector<8x100xf32>
    %75 = arith.mulf %74, %72 : vector<8x100xf32>
    %76 = arith.addf %70, %75 : vector<8x100xf32>
    %c0_44 = arith.constant 0 : index
    %c3_45 = arith.constant 3 : index
    %c0_46 = arith.constant 0 : index
    %77 = vector.load %arg4[%c0_44, %c3_45, %c0_46] : memref<8x8x100xf32, #tpu.memory_space<vmem>>, vector<8x1x100xf32>
    %78 = vector.shape_cast %77 : vector<8x1x100xf32> to vector<8x100xf32>
    %79 = vector.extract_strided_slice %56 {offsets = [0, 3], sizes = [8, 1], strides = [1, 1]} : vector<8x8xf32> to vector<8x1xf32>
    %80 = vector.broadcast %79 : vector<8x1xf32> to vector<8x100xf32>
    %81 = arith.mulf %80, %78 : vector<8x100xf32>
    %82 = arith.addf %76, %81 : vector<8x100xf32>
    %c0_47 = arith.constant 0 : index
    %c4_48 = arith.constant 4 : index
    %c0_49 = arith.constant 0 : index
    %83 = vector.load %arg4[%c0_47, %c4_48, %c0_49] : memref<8x8x100xf32, #tpu.memory_space<vmem>>, vector<8x1x100xf32>
    %84 = vector.shape_cast %83 : vector<8x1x100xf32> to vector<8x100xf32>
    %85 = vector.extract_strided_slice %56 {offsets = [0, 4], sizes = [8, 1], strides = [1, 1]} : vector<8x8xf32> to vector<8x1xf32>
    %86 = vector.broadcast %85 : vector<8x1xf32> to vector<8x100xf32>
    %87 = arith.mulf %86, %84 : vector<8x100xf32>
    %88 = arith.addf %82, %87 : vector<8x100xf32>
    %c0_50 = arith.constant 0 : index
    %c5_51 = arith.constant 5 : index
    %c0_52 = arith.constant 0 : index
    %89 = vector.load %arg4[%c0_50, %c5_51, %c0_52] : memref<8x8x100xf32, #tpu.memory_space<vmem>>, vector<8x1x100xf32>
    %90 = vector.shape_cast %89 : vector<8x1x100xf32> to vector<8x100xf32>
    %91 = vector.extract_strided_slice %56 {offsets = [0, 5], sizes = [8, 1], strides = [1, 1]} : vector<8x8xf32> to vector<8x1xf32>
    %92 = vector.broadcast %91 : vector<8x1xf32> to vector<8x100xf32>
    %93 = arith.mulf %92, %90 : vector<8x100xf32>
    %94 = arith.addf %88, %93 : vector<8x100xf32>
    %c0_53 = arith.constant 0 : index
    %c6_54 = arith.constant 6 : index
    %c0_55 = arith.constant 0 : index
    %95 = vector.load %arg4[%c0_53, %c6_54, %c0_55] : memref<8x8x100xf32, #tpu.memory_space<vmem>>, vector<8x1x100xf32>
    %96 = vector.shape_cast %95 : vector<8x1x100xf32> to vector<8x100xf32>
    %97 = vector.extract_strided_slice %56 {offsets = [0, 6], sizes = [8, 1], strides = [1, 1]} : vector<8x8xf32> to vector<8x1xf32>
    %98 = vector.broadcast %97 : vector<8x1xf32> to vector<8x100xf32>
    %99 = arith.mulf %98, %96 : vector<8x100xf32>
    %100 = arith.addf %94, %99 : vector<8x100xf32>
    %c0_56 = arith.constant 0 : index
    %c7_57 = arith.constant 7 : index
    %c0_58 = arith.constant 0 : index
    %101 = vector.load %arg4[%c0_56, %c7_57, %c0_58] : memref<8x8x100xf32, #tpu.memory_space<vmem>>, vector<8x1x100xf32>
    %102 = vector.shape_cast %101 : vector<8x1x100xf32> to vector<8x100xf32>
    %103 = vector.extract_strided_slice %56 {offsets = [0, 7], sizes = [8, 1], strides = [1, 1]} : vector<8x8xf32> to vector<8x1xf32>
    %104 = vector.broadcast %103 : vector<8x1xf32> to vector<8x100xf32>
    %105 = arith.mulf %104, %102 : vector<8x100xf32>
    %106 = arith.addf %100, %105 : vector<8x100xf32>
    %c0_59 = arith.constant 0 : index
    %c0_60 = arith.constant 0 : index
    %107 = vector.load %arg5[%c0_59, %c0_60] : memref<8x100xf32, #tpu.memory_space<vmem>>, vector<8x100xf32>
    tpu.vector_store %arg5[%c0_59, %c0_60], %106 {strides = array<i32>} : memref<8x100xf32, #tpu.memory_space<vmem>>, vector<8x100xf32>,
    return
  }
  func.func @transform_0(%arg0: i32) -> (i32, i32) {
    %c0_i32 = arith.constant 0 : i32
    %c0_i32_0 = arith.constant 0 : i32
    return %arg0, %c0_i32 : i32, i32
  }
  func.func @transform_1(%arg0: i32) -> (i32, i32) {
    %c0_i32 = arith.constant 0 : i32
    %c0_i32_0 = arith.constant 0 : i32
    %c0_i32_1 = arith.constant 0 : i32
    return %c0_i32, %c0_i32_0 : i32, i32
  }
  func.func @transform_2(%arg0: i32) -> (i32, i32) {
    %c0_i32 = arith.constant 0 : i32
    %c0_i32_0 = arith.constant 0 : i32
    %c0_i32_1 = arith.constant 0 : i32
    return %c0_i32, %c0_i32_0 : i32, i32
  }
  func.func @transform_3(%arg0: i32) -> (i32, i32, i32) {
    %c0_i32 = arith.constant 0 : i32
    %c0_i32_0 = arith.constant 0 : i32
    %c0_i32_1 = arith.constant 0 : i32
    return %arg0, %c0_i32, %c0_i32_0 : i32, i32, i32
  }
  func.func @transform_4(%arg0: i32) -> (i32, i32) {
    %c0_i32 = arith.constant 0 : i32
    %c0_i32_0 = arith.constant 0 : i32
    return %arg0, %c0_i32 : i32, i32
  }
  func.func @transform_5(%arg0: i32) -> (i32, i32) {
    %c0_i32 = arith.constant 0 : i32
    %c0_i32_0 = arith.constant 0 : i32
    return %arg0, %c0_i32 : i32, i32
  }
}

</mosaic_0001>

<bundles_post_ra>
// kernel: tpu_custom_call.1
= control target key start
LH: loop header
LB: loop body
LE: loop exit
PB: predicated region body
PF: predicated region fallthrough
CT: control target
= control target key end

     0   :  { %11 = vsyncpa [#allocation3], 0  ;;  %s1210_s0 = inlined_call_operand.hbm [shape: f32[8,50], index: 0, kind: input, shape index: {}]   ;;  %s1211_s1 = inlined_call_operand.hbm [shape: f32[50,100], index: 1, kind: input, shape index: {}]   ;;  %s1212_s2 = inlined_call_operand.vmem [shape: f32[1,100], index: 2, kind: input, shape index: {}]   ;;  %s1213_s3 = inlined_call_operand.hbm [shape: f32[8,8,100], index: 3, kind: input, shape index: {}]   ;;  %s1214_s4 = inlined_call_operand.hbm [shape: f32[8,100], index: 4, kind: output, shape index: {0}]   ;;  %s1215_s5 = inlined_call_operand.hbm [shape: f32[8,8], index: 5, kind: output, shape index: {1}]  }
   0x1   :  { %12 = vsyncpa [#allocation6], 0 }
   0x2   :  { %13 = vsyncpa [#allocation4], 0 }
   0x3   :  { %14 = vsyncpa [#allocation10], 0  ;;  %s962_s18 = smov [#allocation5]  }
   0x4   :  { %s30_s19 = sshll.u32 %s962_s18, 4  ;;  %s31_s19 = int_to_ptr.vmem [resolvable:$true] %s30_s19 }
   0x5   :  { %s862_s20 = scalar_lea.vmem %s31_s19, 896  ;;  %p867_p1 = scmp.lt.s32.totalorder %s31_s19, %s31_s19 }
   0x6   :  { %p863_p0 = scmp.ne.s32.totalorder %s31_s19, %s862_s20  ;;  %p868_p2 = scmp.lt.s32.totalorder %s862_s20, %s862_s20 }
   0x8   :  { %p869_p3 = por %p868_p2, %p867_p1 }
   0xa   :  { %p870_p4 = pnand %p869_p3, %p863_p0 }
   0xc   :  { %873 = shalt.err (!%p870_p4)
}
   0xd   :  { %s963_s21 = smov 128   ;;  %s964_s22 = smov 8  }
   0xe   :  { %36 = dma.hbm_to_vmem [thread:$0]  %s1211_s1, 896, %s31_s19, [#allocation6], %s963_s21, %s963_s21, %s964_s22  }
   0xf   :  { %s965_s25 = smov [#allocation2]   ;;  %s966_s27 = smov [#allocation7]  }
  0x10   :  { %s21_s26 = sshll.u32 %s965_s25, 4  ;;  %s44_s28 = sshll.u32 %s966_s27, 4  ;;  %s22_s26 = int_to_ptr.vmem [resolvable:$true] %s21_s26  ;;  %s45_s28 = int_to_ptr.vmem [resolvable:$true] %s44_s28 }
  0x11   :  { %s882_s29 = scalar_lea.vmem %s22_s26, 128  ;;  %p887_p6 = scmp.lt.s32.totalorder %s22_s26, %s22_s26 }
  0x12   :  { %p883_p5 = scmp.ne.s32.totalorder %s22_s26, %s882_s29  ;;  %p888_p7 = scmp.lt.s32.totalorder %s882_s29, %s882_s29 }
  0x14   :  { %p889_p8 = por %p888_p7, %p887_p6 }
  0x16   :  { %p890_p9 = pnand %p889_p8, %p883_p5 }
  0x18   :  { %893 = shalt.err (!%p890_p9)
}
  0x19   :  { %24 = dma.hbm_to_vmem [thread:$0]  %s1210_s0, 128, %s22_s26, [#allocation3]  }
  0x1a   :  { %s902_s7 = scalar_lea.vmem %s45_s28, 1024  ;;  %p907_p11 = scmp.lt.s32.totalorder %s45_s28, %s45_s28 }
  0x1b   :  { %p903_p10 = scmp.ne.s32.totalorder %s45_s28, %s902_s7  ;;  %p908_p12 = scmp.lt.s32.totalorder %s902_s7, %s902_s7 }
  0x1d   :  { %p909_p13 = por %p908_p12, %p907_p11 }
  0x1f   :  { %p910_p0 = pnand %p909_p13, %p903_p10 }
  0x21   :  { %913 = shalt.err (!%p910_p0)
}
  0x22   :  { %50 = dma.hbm_to_vmem [thread:$0]  %s1213_s3, 1024, %s45_s28, [#allocation6], %s963_s21, %s963_s21, %s964_s22  }
  0x23   :  { %954 = dma.done.wait [#allocation3], 128  }
  0x24   :  { %955 = vsyncadd [#allocation3], 4294967168 }
  0x25   :  { %956 = dma.done.wait [#allocation6], 1920  }
  0x26   :  { %957 = vsyncadd [#allocation6], 4294965376  ;;  %v967_v0 = vmov 0.0   ;;  %vm968_vm0 = vmmov 0   ;;  %vm79_vm1 = vcmask 1041408   ;;  %v66_v2 = vld [vmem:[#allocation5 + $0x28] sm:$0xff] }
  0x27   :  { %807 = vmatprep.subr.mxu0 %v967_v0  ;;  %821 = vmatprep.mubr.msk.f32.mxu0 %vm968_vm0, %v967_v0  ;;  %v67_v1 = vld [vmem:[#allocation5 + $0x30] sm:$0x3]  ;;  %v65_v3 = vld [vmem:[#allocation5 + $0x20] sm:$0xff]  ;;  %v64_v4 = vld [vmem:[#allocation5 + $0x18] sm:$0xff]  ;;  %vm75_vm2 = vcmask 408576   ;;  %vm170_vm3 = vcmask 1041409  }
  0x28   :  { %808 = vmatpush3.msk.msra.mxu0 %vm79_vm1, %v67_v1  ;;  %v63_v5 = vld [vmem:[#allocation5 + $0x10] sm:$0xff]  ;;  %v62_v6 = vld [vmem:[#allocation5 + $0x8] sm:$0xff]  ;;  %v61_v7 = vld [vmem:[#allocation5] sm:$0xff]  ;;  %vm173_vm4 = vcmask 1042434   ;;  %vm176_vm5 = vcmask 1043459   ;;  %vm179_vm6 = vcmask 1044484  }
  0x29   :  { %809 = vmatprep.subr.mxu0 %v967_v0  ;;  %v60_v8 = vld [vmem:[#allocation2] sm:$0xff]  ;;  %v232_v9 = vld [vmem:[#allocation7 + $0xa] sm:$0x1]  ;;  %v233_v10 = vld [vmem:[#allocation7 + $0x12] sm:$0x1]  ;;  %vm182_vm7 = vcmask 1045509  }
  0x2a   :  { %810 = vmatpush3.msra.mxu0 %v66_v2  ;;  %v247_v11 = vrot.slane %v232_v9, 7  ;;  %v231_v12 = vld [vmem:[#allocation7 + $0x2] sm:$0x1]  ;;  %v234_v13 = vld [vmem:[#allocation7 + $0x1a] sm:$0x1]  ;;  %v249_v14 = vrot.slane %v233_v10, 6 }
  0x2b   :  { %811 = vmatprep.subr.mxu0 %v967_v0  ;;  %v154_v15 = vld [vmem:[#allocation7 + $0x8] sm:$0x1]  ;;  %v235_v16 = vld [vmem:[#allocation7 + $0x22] sm:$0x1]  ;;  %v236_v18 = vld [vmem:[#allocation7 + $0x2a] sm:$0x1] }
  0x2c   :  { %812 = vmatpush3.msra.mxu0 %v65_v3  ;;  %v248_v17 = vsel %vm170_vm3, %v247_v11, %v231_v12  ;;  %v1019_v19 = vld [vmem:[#allocation7 + $0x32] sm:$0x1]  ;;  %v251_v20 = vrot.slane %v234_v13, 5  ;;  %v155_v21 = vld [vmem:[#allocation7 + $0x10] sm:$0x1]  ;;  %v169_v22 = vrot.slane %v154_v15, 7 }
  0x2d   :  { %813 = vmatprep.subr.mxu0 %v967_v0  ;;  %v267_v23 = vld [vmem:[#allocation7 + $0xb] sm:$0x1]  ;;  %v250_v24 = vsel %vm173_vm4, %v249_v14, %v248_v17  ;;  %v253_v25 = vrot.slane %v235_v16, 4  ;;  %v153_v26 = vld [vmem:[#allocation7] sm:$0x1]  ;;  %v255_v29 = vrot.slane %v236_v18, 3 }
  0x2e   :  { %814 = vmatpush3.msra.mxu0 %v64_v4  ;;  %v156_v27 = vld [vmem:[#allocation7 + $0x18] sm:$0x1]  ;;  %v1022_v28 = vld [vmem:[#allocation7 + $0x3a] sm:$0x1]  ;;  %v157_v30 = vld [vmem:[#allocation7 + $0x20] sm:$0x1]  ;;  %v252_v34 = vsel %vm176_vm5, %v251_v20, %v250_v24  ;;  %v171_v37 = vsel %vm170_vm3, %v169_v22, %v153_v26 }
  0x2f   :  { %815 = vmatprep.subr.mxu0 %v967_v0  ;;  %vm185_vm8 = vcmask 1046534   ;;  %v257_v31 = vrot.slane %v1019_v19, 2  ;;  %v1025_v32 = vld [vmem:[#allocation7 + $0x28] sm:$0x1]  ;;  %v172_v33 = vrot.slane %v155_v21, 6  ;;  %vm188_vm9 = vcmask 1047559  }
  0x30   :  { %816 = vmatpush3.msra.mxu0 %v63_v5  ;;  %v1028_v35 = vld [vmem:[#allocation7 + $0x30] sm:$0x1]  ;;  %v1030_v36 = vld [vmem:[#allocation7 + $0x38] sm:$0x1]  ;;  %v197_v38 = vld [vmem:[#allocation7 + $0x9] sm:$0x1]  ;;  %v254_v46 = vsel %vm179_vm6, %v253_v25, %v252_v34 }
  0x31   :  { %817 = vmatprep.subr.mxu0 %v967_v0  ;;  %v259_v39 = vrot.slane %v1022_v28, 1  ;;  %v175_v40 = vrot.slane %v156_v27, 5  ;;  %v268_v41 = vld [vmem:[#allocation7 + $0x13] sm:$0x1]  ;;  %v282_v42 = vrot.slane %v267_v23, 7  ;;  %v174_v47 = vsel %vm173_vm4, %v172_v33, %v171_v37 }
  0x32   :  { %818 = vmatpush3.msra.mxu0 %v62_v6  ;;  %v266_v43 = vld [vmem:[#allocation7 + $0x3] sm:$0x1]  ;;  %v269_v44 = vld [vmem:[#allocation7 + $0x1b] sm:$0x1]  ;;  %v178_v48 = vrot.slane %v157_v30, 4  ;;  %v212_v50 = vrot.slane %v197_v38, 7  ;;  %v256_v61 = vsel %vm182_vm7, %v255_v29, %v254_v46 }
  0x33   :  { %819 = vmatprep.subr.mxu0 %v967_v0  ;;  %v1034_v45 = vld [vmem:[#allocation7 + $0x23] sm:$0x1]  ;;  %v198_v49 = vld [vmem:[#allocation7 + $0x11] sm:$0x1]  ;;  %v337_v51 = vld [vmem:[#allocation7 + $0xd] sm:$0x1]  ;;  %v283_v59 = vsel %vm170_vm3, %v282_v42, %v266_v43  ;;  %v177_v62 = vsel %vm176_vm5, %v175_v40, %v174_v47  ;;  %v258_v13 = vsel %vm185_vm8, %v257_v31, %v256_v61 }
  0x34   :  { %820 = vmatpush3.msra.mxu0 %v61_v7  ;;  %v181_v52 = vrot.slane %v1025_v32, 3  ;;  %v284_v53 = vrot.slane %v268_v41, 6  ;;  %v196_v54 = vld [vmem:[#allocation7 + $0x1] sm:$0x1]  ;;  %v302_v55 = vld [vmem:[#allocation7 + $0xc] sm:$0x1]  ;;  %v180_v14 = vsel %vm179_vm6, %v178_v48, %v177_v62  ;;  %v1059_v32 = vsel %vm188_vm9, %v259_v39, %v258_v13 }
  0x35   :  { %822 = vmatmul.mubr.msk.f32.vlgmr.msra.gmra.mxu0 %vm75_vm2, %v60_v8  ;;  %v184_v56 = vrot.slane %v1028_v35, 2  ;;  %v187_v57 = vrot.slane %v1030_v36, 1  ;;  %v1041_v58 = vld [vmem:[#allocation7 + $0x2b] sm:$0x1]  ;;  %v286_v60 = vrot.slane %v269_v44, 5  ;;  %v214_v0 = vrot.slane %v198_v49, 6 }
  0x36   :  { %v199_v63 = vld [vmem:[#allocation7 + $0x19] sm:$0x1]  ;;  %v338_v1 = vld [vmem:[#allocation7 + $0x15] sm:$0x1]  ;;  %v352_v2 = vrot.slane %v337_v51, 7  ;;  %v288_v3 = vrot.slane %v1034_v45, 4  ;;  %v213_v4 = vsel %vm170_vm3, %v212_v50, %v196_v54  ;;  %v285_v9 = vsel %vm173_vm4, %v284_v53, %v283_v59 }
  0x37   :  { %v336_v5 = vld [vmem:[#allocation7 + $0x5] sm:$0x1]  ;;  %v303_v6 = vld [vmem:[#allocation7 + $0x14] sm:$0x1]  ;;  %v317_v7 = vrot.slane %v302_v55, 7  ;;  %v216_v16 = vrot.slane %v199_v63, 5  ;;  %v215_v21 = vsel %vm173_vm4, %v214_v0, %v213_v4  ;;  %v287_v26 = vsel %vm176_vm5, %v286_v60, %v285_v9 }
  0x38   :  { %v1048_v8 = vld [vmem:[#allocation7 + $0x33] sm:$0x1]  ;;  %v301_v10 = vld [vmem:[#allocation7 + $0x4] sm:$0x1]  ;;  %v407_v11 = vld [vmem:[#allocation7 + $0xf] sm:$0x1]  ;;  %v353_v23 = vsel %vm170_vm3, %v352_v2, %v336_v5  ;;  %v183_v33 = vsel %vm182_vm7, %v181_v52, %v180_v14  ;;  %v289_v46 = vsel %vm179_vm6, %v288_v3, %v287_v26 }
  0x39   :  { %v372_v12 = vld [vmem:[#allocation7 + $0xe] sm:$0x1]  ;;  %v200_v15 = vld [vmem:[#allocation7 + $0x21] sm:$0x1]  ;;  %v339_v17 = vld [vmem:[#allocation7 + $0x1d] sm:$0x1]  ;;  %v318_v27 = vsel %vm170_vm3, %v317_v7, %v301_v10  ;;  %v217_v42 = vsel %vm176_vm5, %v216_v16, %v215_v21  ;;  %v186_v59 = vsel %vm185_vm8, %v184_v56, %v183_v33 }
  0x3a   :  { %v354_v18 = vrot.slane %v338_v1, 6  ;;  %v290_v19 = vrot.slane %v1041_v58, 3  ;;  %v201_v20 = vld [vmem:[#allocation7 + $0x29] sm:$0x1]  ;;  %v340_v22 = vld [vmem:[#allocation7 + $0x25] sm:$0x1] }
  0x3b   :  { %v304_v24 = vld [vmem:[#allocation7 + $0x1c] sm:$0x1]  ;;  %v319_v25 = vrot.slane %v303_v6, 6  ;;  %v408_v28 = vld [vmem:[#allocation7 + $0x17] sm:$0x1]  ;;  %v422_v29 = vrot.slane %v407_v11, 7 }
  0x3c   :  { %v373_v30 = vld [vmem:[#allocation7 + $0x16] sm:$0x1]  ;;  %v387_v31 = vrot.slane %v372_v12, 7  ;;  %v218_v34 = vrot.slane %v200_v15, 4  ;;  %v356_v37 = vrot.slane %v339_v17, 5  ;;  %v292_v41 = vrot.slane %v1048_v8, 2 }
  0x3d   :  { %v406_v38 = vld [vmem:[#allocation7 + $0x7] sm:$0x1]  ;;  %v371_v40 = vld [vmem:[#allocation7 + $0x6] sm:$0x1]  ;;  %v355_v43 = vsel %vm173_vm4, %v354_v18, %v353_v23  ;;  %v305_v44 = vld [vmem:[#allocation7 + $0x24] sm:$0x1]  ;;  %v320_v47 = vsel %vm173_vm4, %v319_v25, %v318_v27  ;;  %v291_v1 = vsel %vm182_vm7, %v290_v19, %v289_v46 }
  0x3e   :  { %v321_v45 = vrot.slane %v304_v24, 5  ;;  %v409_v39 = vld [vmem:[#allocation7 + $0x1f] sm:$0x1]  ;;  %v424_v48 = vrot.slane %v408_v28, 6  ;;  %v374_v49 = vld [vmem:[#allocation7 + $0x1e] sm:$0x1]  ;;  %v423_v55 = vsel %vm170_vm3, %v422_v29, %v406_v38  ;;  %v388_v58 = vsel %vm170_vm3, %v387_v31, %v371_v40 }
  0x3f   :  { %v389_v50 = vrot.slane %v373_v30, 6  ;;  %v202_v51 = vld [vmem:[#allocation7 + $0x31] sm:$0x1]  ;;  %v220_v52 = vrot.slane %v201_v20, 3  ;;  %v341_v53 = vld [vmem:[#allocation7 + $0x2d] sm:$0x1]  ;;  %v219_v61 = vsel %vm179_vm6, %v218_v34, %v217_v42  ;;  %v357_v62 = vsel %vm176_vm5, %v356_v37, %v355_v43 }
  0x40   :  { %v358_v54 = vrot.slane %v340_v22, 4  ;;  %v273_v60 = vld [vmem:[#allocation7 + $0x3b] sm:$0x1]  ;;  %v306_v63 = vld [vmem:[#allocation7 + $0x2c] sm:$0x1]  ;;  %v323_v0 = vrot.slane %v305_v44, 4  ;;  %v322_v2 = vsel %vm176_vm5, %v321_v45, %v320_v47  ;;  %v425_v9 = vsel %vm173_vm4, %v424_v48, %v423_v55 }
  0x41   :  { %vm192_vm10 = vcmask 818176   ;;  %v410_v3 = vld [vmem:[#allocation7 + $0x27] sm:$0x1]  ;;  %v426_v4 = vrot.slane %v409_v39, 5  ;;  %v375_v5 = vld [vmem:[#allocation7 + $0x26] sm:$0x1]  ;;  %v390_v10 = vsel %vm173_vm4, %v389_v50, %v388_v58  ;;  %v221_v12 = vsel %vm182_vm7, %v220_v52, %v219_v61 }
  0x42   :  { %v391_v6 = vrot.slane %v374_v49, 5  ;;  %v203_v7 = vld [vmem:[#allocation7 + $0x39] sm:$0x1]  ;;  %v222_v35 = vrot.slane %v202_v51, 2  ;;  %v342_v8 = vld [vmem:[#allocation7 + $0x35] sm:$0x1]  ;;  %v359_v13 = vsel %vm179_vm6, %v358_v54, %v357_v62  ;;  %v293_v16 = vsel %vm185_vm8, %v292_v41, %v291_v1 }
  0x43   :  { %v360_v56 = vrot.slane %v341_v53, 3  ;;  %v294_v11 = vrot.slane %v273_v60, 1  ;;  %v307_v14 = vld [vmem:[#allocation7 + $0x34] sm:$0x1]  ;;  %v325_v15 = vrot.slane %v306_v63, 3  ;;  %v324_v17 = vsel %vm179_vm6, %v323_v0, %v322_v2 }
  0x44   :  { %v411_v18 = vld [vmem:[#allocation7 + $0x2f] sm:$0x1]  ;;  %v428_v19 = vrot.slane %v410_v3, 4  ;;  %v376_v20 = vld [vmem:[#allocation7 + $0x2e] sm:$0x1]  ;;  %v393_v21 = vrot.slane %v375_v5, 4  ;;  %v427_v26 = vsel %vm176_vm5, %v426_v4, %v425_v9  ;;  %v392_v27 = vsel %vm176_vm5, %v391_v6, %v390_v10 }
  0x45   :  { %v796_v22 = vld [vmem:[%s1212_s2] ss:$0 sm:$0xff]  ;;  %v224_v23 = vrot.slane %v203_v7, 1  ;;  %v343_v24 = vld [vmem:[#allocation7 + $0x3d] sm:$0x1]  ;;  %v362_v25 = vrot.slane %v342_v8, 2  ;;  %v189_v28 = vsel %vm188_vm9, %v187_v57, %v186_v59  ;;  %v223_v29 = vsel %vm185_vm8, %v222_v35, %v221_v12 }
  0x46   :  { %v361_v30 = vsel %vm182_vm7, %v360_v56, %v359_v13  ;;  %v308_v31 = vld [vmem:[#allocation7 + $0x3c] sm:$0x1]  ;;  %v327_v33 = vrot.slane %v307_v14, 2  ;;  %v412_v34 = vld [vmem:[#allocation7 + $0x37] sm:$0x1]  ;;  %v295_v38 = vsel %vm188_vm9, %v294_v11, %v293_v16  ;;  %v326_v40 = vsel %vm182_vm7, %v325_v15, %v324_v17  ;;  %s977_s2 = smov [#allocation9]  }
  0x47   :  { %v430_v41 = vrot.slane %v411_v18, 3  ;;  %v377_v42 = vld [vmem:[#allocation7 + $0x36] sm:$0x1]  ;;  %v395_v43 = vrot.slane %v376_v20, 3  ;;  %v364_v45 = vrot.slane %v343_v24, 1  ;;  %v429_v36 = vsel %vm179_vm6, %v428_v19, %v427_v26  ;;  %s782_s9 = sshll.u32 %s977_s2, 4  ;;  %s783_s9 = int_to_ptr.vmem [resolvable:$true] %s782_s9 }
  0x48   :  { %v394_v57 = vsel %vm179_vm6, %v393_v21, %v392_v27  ;;  %v225_v47 = vsel %vm188_vm9, %v224_v23, %v223_v29  ;;  %v363_v39 = vsel %vm185_vm8, %v362_v25, %v361_v30  ;;  %v329_v48 = vrot.slane %v308_v31, 1  ;;  %v413_v53 = vld [vmem:[#allocation7 + $0x3f] sm:$0x1]  ;;  %v378_v54 = vld [vmem:[#allocation7 + $0x3e] sm:$0x1]  ;;  %s914_s10 = scalar_lea.vmem %s783_s9, 128  ;;  %p919_p2 = scmp.lt.s32.totalorder %s783_s9, %s783_s9 }
  0x49   :  { %v432_v49 = vrot.slane %v412_v34, 2  ;;  %v328_v52 = vsel %vm185_vm8, %v327_v33, %v326_v40  ;;  %v397_v55 = vrot.slane %v377_v42, 2  ;;  %v431_v58 = vsel %vm182_vm7, %v430_v41, %v429_v36  ;;  %p915_p1 = scmp.ne.s32.totalorder %s783_s9, %s914_s10  ;;  %p920_p3 = scmp.lt.s32.totalorder %s914_s10, %s914_s10 }
  0x4a   :  { %v396_v59 = vsel %vm182_vm7, %v395_v43, %v394_v57  ;;  %v330_v0 = vsel %vm188_vm9, %v329_v48, %v328_v52  ;;  %v434_v1 = vrot.slane %v413_v53, 1  ;;  %v399_v2 = vrot.slane %v378_v54, 1 }
  0x4b   :  { %v433_v3 = vsel %vm185_vm8, %v432_v49, %v431_v58  ;;  %v398_v4 = vsel %vm185_vm8, %v397_v55, %v396_v59  ;;  %vm441_vm11 = vcmask 7168   ;;  %vm443_vm12 = vcmask 15360   ;;  %p921_p4 = por %p920_p3, %p919_p2 }
  0x4c   :  { %v435_v8 = vsel %vm188_vm9, %v434_v1, %v433_v3  ;;  %v400_v56 = vsel %vm188_vm9, %v399_v2, %v398_v4  ;;  %vm445_vm13 = vcmask 23552   ;;  %vm447_vm14 = vcmask 31744  }
  0x4d   :  { %vm449_vm15 = vcmask 39936   ;;  %vm451_vm0 = vcmask 48128   ;;  %vm453_vm1 = vcmask 56320   ;;  %vm455_vm2 = vcmask 64512   ;;  %p922_p5 = pnand %p921_p4, %p915_p1 }
  0x4e   :  { %v969_v40 = vmov 1   ;;  %v970_v41 = vmov 0   ;;  %v972_v36 = vmov 7   ;;  %v973_v57 = vmov 3  }
  0x4f   :  { %842 = vset.pattern.permute.xlu1 %v969_v40  ;;  %841 = vset.pattern.permute.xlu0 %v970_v41 }
  0xf5   :  { %v149_v37 = vpop.f32.mrf.mxu0 }
  0xf6   :  { %v150_v44 = vadd.f32 %v796_v22, %v149_v37 }
  0xf7   :  { %v823_v46 = vpop.f32.mrf.mxu0 }
  0xf8   :  { %v262_v50 = vmul.f32 %v1059_v32, %v150_v44  ;;  %v191_v51 = vmul.f32 %v189_v28, %v150_v44  ;;  %v297_v62 = vmul.f32 %v295_v38, %v150_v44  ;;  %v227_v63 = vmul.f32 %v225_v47, %v150_v44 }
  0xf9   :  { %v365_v32 = vsel %vm188_vm9, %v364_v45, %v363_v39  ;;  %v332_v35 = vmul.f32 %v330_v0, %v150_v44  ;;  %v437_v11 = vmul.f32 %v435_v8, %v150_v44  ;;  %v402_v12 = vmul.f32 %v400_v56, %v150_v44 }
  0xfa   :  { %v263_v60 = vsel %vm192_vm10, %v262_v50, 0.0  ;;  %v193_v61 = vsel %vm192_vm10, %v191_v51, 0.0  ;;  %v298_v5 = vsel %vm192_vm10, %v297_v62, 0.0  ;;  %v228_v6 = vsel %vm192_vm10, %v227_v63, 0.0 }
  0xfb   :  { %264 = vadd.xlane.f32.xlu1 %v263_v60  ;;  %194 = vadd.xlane.f32.xlu0 %v193_v61  ;;  %v367_v7 = vmul.f32 %v365_v32, %v150_v44  ;;  %v333_v10 = vsel %vm192_vm10, %v332_v35, 0.0  ;;  %v438_v13 = vsel %vm192_vm10, %v437_v11, 0.0  ;;  %v403_v14 = vsel %vm192_vm10, %v402_v12, 0.0 }
  0xfc   :  { %v971_v45 = vmov 2   ;;  %v974_v46 = vmov 4   ;;  %v975_v47 = vmov 5   ;;  %v976_v39 = vmov 6  }
  0xfd   :  { %v368_v9 = vsel %vm192_vm10, %v367_v7, 0.0 }
  0xff   :  { %299 = vadd.xlane.f32.xlu1 %v298_v5  ;;  %229 = vadd.xlane.f32.xlu0 %v228_v6 }
 0x103   :  { %369 = vadd.xlane.f32.xlu1 %v368_v9  ;;  %334 = vadd.xlane.f32.xlu0 %v333_v10 }
 0x107   :  { %439 = vadd.xlane.f32.xlu1 %v438_v13  ;;  %404 = vadd.xlane.f32.xlu0 %v403_v14 }
 0x184   :  { %v265_v15 = vpop.xlane.xlu1 %264  ;;  %v195_v16 = vpop.xlane.xlu0 %194 }
 0x188   :  { %v300_v17 = vpop.xlane.xlu1 %299  ;;  %v230_v18 = vpop.xlane.xlu0 %229 }
 0x189   :  { %v442_v19 = vsel %vm441_vm11, %v195_v16, %v230_v18 }
 0x18a   :  { %v444_v20 = vsel %vm443_vm12, %v442_v19, %v265_v15 }
 0x18b   :  { %v446_v21 = vsel %vm445_vm13, %v444_v20, %v300_v17 }
 0x18c   :  { %v370_v22 = vpop.xlane.xlu1 %369  ;;  %v335_v23 = vpop.xlane.xlu0 %334 }
 0x18d   :  { %v448_v24 = vsel %vm447_vm14, %v446_v21, %v335_v23 }
 0x18e   :  { %v450_v26 = vsel %vm449_vm15, %v448_v24, %v370_v22 }
 0x190   :  { %v440_v25 = vpop.xlane.xlu1 %439  ;;  %v405_v27 = vpop.xlane.xlu0 %404 }
 0x191   :  { %v452_v28 = vsel %vm451_vm0, %v450_v26, %v405_v27 }
 0x192   :  { %v454_v29 = vsel %vm453_vm1, %v452_v28, %v440_v25 }
 0x193   :  { %v456_v30 = vsel %vm455_vm2, %v454_v29, -inf }
 0x194   :  { %457 = vmax.xlane.f32.xlu0 %v456_v30 }
 0x21d   :  { %v458_v31 = vpop.xlane.xlu0 %457 }
 0x21e   :  { %v459_v33 = vsub.f32 %v454_v29, %v458_v31 }
 0x220   :  { %v460_v34 = vmul.f32 1.442695, %v459_v33 }
 0x222   :  { %850 = vpow2.f32 %v460_v34 }
 0x22f   :  { %v851_v37 = vpop.eup %850 }
 0x230   :  { %v462_v38 = vsel %vm455_vm2, %v851_v37, 0.0 }
 0x231   :  { %463 = vadd.xlane.f32.xlu1 %v462_v38 }
 0x2ba   :  { %v464_v42 = vpop.xlane.xlu1 %463 }
 0x2bb   :  { %852 = vrcp.f32 %v464_v42 }
 0x2c8   :  { %v853_v43 = vpop.eup %852 }
 0x2c9   :  { %v466_v44 = vmul.f32 %v853_v43, %v851_v37 }
 0x2cb   :  { %467 = vst.msk [vmem:[#allocation9] sm:$0xff] %vm455_vm2, %v466_v44  ;;  %515 = vperm.xlu1 %842, %v466_v44   ;;  %478 = vperm.xlu0 %841, %v466_v44  }
 0x2cf   :  { %843 = vset.pattern.permute.xlu1 %v971_v45  ;;  %849 = vset.pattern.permute.xlu0 %v972_v36 }
 0x2d0   :  { %552 = vperm.xlu1 %843, %v466_v44  }
 0x2d4   :  { %844 = vset.pattern.permute.xlu1 %v973_v57 }
 0x2d5   :  { %589 = vperm.xlu1 %844, %v466_v44  }
 0x2d9   :  { %845 = vset.pattern.permute.xlu1 %v974_v46 }
 0x2da   :  { %626 = vperm.xlu1 %845, %v466_v44  }
 0x2de   :  { %846 = vset.pattern.permute.xlu1 %v975_v47 }
 0x2df   :  { %663 = vperm.xlu1 %846, %v466_v44  }
 0x2e3   :  { %847 = vset.pattern.permute.xlu1 %v976_v39 }
 0x2e4   :  { %700 = vperm.xlu1 %847, %v466_v44  }
 0x2e8   :  { %848 = vset.pattern.permute.xlu1 %v972_v36 }
 0x2e9   :  { %737 = vperm.xlu1 %848, %v466_v44  }
 0x2ea   :  { %925 = shalt.err (!%p922_p5)
}
 0x2eb   :  { %785 = dma.vmem_to_hbm [thread:$0]  %s783_s9, 128, %s1215_s5, [#allocation10]   ;;  %v507_v48 = vld [vmem:[#allocation7 + $0x9] sm:$0x1]  ;;  %v508_v49 = vld [vmem:[#allocation7 + $0x11] sm:$0x1] }
 0x2ec   :  { %v526_v50 = vrot.slane %v507_v48, 7  ;;  %v506_v51 = vld [vmem:[#allocation7 + $0x1] sm:$0x1]  ;;  %v509_v52 = vld [vmem:[#allocation7 + $0x19] sm:$0x1]  ;;  %v528_v53 = vrot.slane %v508_v49, 6 }
 0x2ed   :  { %v510_v55 = vld [vmem:[#allocation7 + $0x21] sm:$0x1]  ;;  %v530_v58 = vrot.slane %v509_v52, 5  ;;  %v469_v60 = vld [vmem:[#allocation7 + $0x8] sm:$0x1]  ;;  %s978_s5 = smov [#allocation8]  }
 0x2ee   :  { %v527_v54 = vsel %vm170_vm3, %v526_v50, %v506_v51  ;;  %v511_v61 = vld [vmem:[#allocation7 + $0x29] sm:$0x1]  ;;  %v544_v62 = vld [vmem:[#allocation7 + $0xa] sm:$0x1]  ;;  %v512_v63 = vld [vmem:[#allocation7 + $0x31] sm:$0x1] }
 0x2ef   :  { %v529_v59 = vsel %vm173_vm4, %v528_v53, %v527_v54  ;;  %v1124_v32 = vld [vmem:[#allocation7 + $0x39] sm:$0x1]  ;;  %v532_v0 = vrot.slane %v510_v55, 4  ;;  %v468_v2 = vld [vmem:[#allocation7] sm:$0x1]  ;;  %v489_v4 = vrot.slane %v469_v60, 7 }
 0x2f0   :  { %v531_v1 = vsel %vm176_vm5, %v530_v58, %v529_v59  ;;  %v470_v3 = vld [vmem:[#allocation7 + $0x10] sm:$0x1]  ;;  %v534_v5 = vrot.slane %v511_v61, 3  ;;  %v471_v6 = vld [vmem:[#allocation7 + $0x18] sm:$0x1]  ;;  %v563_v35 = vrot.slane %v544_v62, 7 }
 0x2f1   :  { %v545_v7 = vld [vmem:[#allocation7 + $0x12] sm:$0x1]  ;;  %v472_v8 = vld [vmem:[#allocation7 + $0x20] sm:$0x1]  ;;  %v543_v56 = vld [vmem:[#allocation7 + $0x2] sm:$0x1]  ;;  %v533_v10 = vsel %vm179_vm6, %v532_v0, %v531_v1  ;;  %v490_v15 = vsel %vm170_vm3, %v489_v4, %v468_v2 }
 0x2f2   :  { %v581_v9 = vld [vmem:[#allocation7 + $0xb] sm:$0x1]  ;;  %v536_v11 = vrot.slane %v512_v63, 2  ;;  %v538_v12 = vrot.slane %v1124_v32, 1  ;;  %v1129_v13 = vld [vmem:[#allocation7 + $0x28] sm:$0x1]  ;;  %v564_v22 = vsel %vm170_vm3, %v563_v35, %v543_v56  ;;  %v535_v25 = vsel %vm182_vm7, %v534_v5, %v533_v10 }
 0x2f3   :  { %v491_v14 = vrot.slane %v470_v3, 6  ;;  %v493_v16 = vrot.slane %v471_v6, 5  ;;  %v546_v17 = vld [vmem:[#allocation7 + $0x1a] sm:$0x1]  ;;  %v565_v18 = vrot.slane %v545_v7, 6  ;;  %v495_v21 = vrot.slane %v472_v8, 4 }
 0x2f4   :  { %v618_v19 = vld [vmem:[#allocation7 + $0xc] sm:$0x1]  ;;  %v1132_v20 = vld [vmem:[#allocation7 + $0x30] sm:$0x1]  ;;  %v582_v23 = vld [vmem:[#allocation7 + $0x13] sm:$0x1]  ;;  %v537_v45 = vsel %vm185_vm8, %v536_v11, %v535_v25 }
 0x2f5   :  { %v600_v24 = vrot.slane %v581_v9, 7  ;;  %v547_v26 = vld [vmem:[#allocation7 + $0x22] sm:$0x1]  ;;  %v580_v27 = vld [vmem:[#allocation7 + $0x3] sm:$0x1]  ;;  %v492_v30 = vsel %vm173_vm4, %v491_v14, %v490_v15  ;;  %v567_v31 = vrot.slane %v546_v17, 5  ;;  %v566_v41 = vsel %vm173_vm4, %v565_v18, %v564_v22 }
 0x2f6   :  { %v655_v28 = vld [vmem:[#allocation7 + $0xd] sm:$0x1]  ;;  %v1136_v29 = vld [vmem:[#allocation7 + $0x38] sm:$0x1]  ;;  %v583_v33 = vld [vmem:[#allocation7 + $0x1b] sm:$0x1]  ;;  %v494_v49 = vsel %vm176_vm5, %v493_v16, %v492_v30  ;;  %v1150_v62 = vsel %vm188_vm9, %v538_v12, %v537_v45 }
 0x2f7   :  { %v619_v34 = vld [vmem:[#allocation7 + $0x14] sm:$0x1]  ;;  %v637_v37 = vrot.slane %v618_v19, 7  ;;  %v497_v38 = vrot.slane %v1129_v13, 3  ;;  %v548_v40 = vld [vmem:[#allocation7 + $0x2a] sm:$0x1]  ;;  %v601_v47 = vsel %vm170_vm3, %v600_v24, %v580_v27  ;;  %v568_v54 = vsel %vm176_vm5, %v567_v31, %v566_v41 }
 0x2f8   :  { %v602_v42 = vrot.slane %v582_v23, 6  ;;  %v617_v43 = vld [vmem:[#allocation7 + $0x4] sm:$0x1]  ;;  %v692_v44 = vld [vmem:[#allocation7 + $0xe] sm:$0x1]  ;;  %v499_v57 = vrot.slane %v1132_v20, 2  ;;  %v496_v3 = vsel %vm179_vm6, %v495_v21, %v494_v49 }
 0x2f9   :  { %v584_v46 = vld [vmem:[#allocation7 + $0x23] sm:$0x1]  ;;  %v656_v39 = vld [vmem:[#allocation7 + $0x15] sm:$0x1]  ;;  %v674_v48 = vrot.slane %v655_v28, 7  ;;  %v569_v50 = vrot.slane %v547_v26, 4  ;;  %v638_v58 = vsel %vm170_vm3, %v637_v37, %v617_v43  ;;  %v498_v22 = vsel %vm182_vm7, %v497_v38, %v496_v3 }
 0x2fa   :  { %v620_v51 = vld [vmem:[#allocation7 + $0x1c] sm:$0x1]  ;;  %v639_v52 = vrot.slane %v619_v34, 6  ;;  %v654_v53 = vld [vmem:[#allocation7 + $0x5] sm:$0x1]  ;;  %v604_v55 = vrot.slane %v583_v33, 5  ;;  %v603_v32 = vsel %vm173_vm4, %v602_v42, %v601_v47 }
 0x2fb   :  { %v657_v59 = vld [vmem:[#allocation7 + $0x1d] sm:$0x1]  ;;  %v693_v60 = vld [vmem:[#allocation7 + $0x16] sm:$0x1]  ;;  %v711_v61 = vrot.slane %v692_v44, 7  ;;  %v501_v63 = vrot.slane %v1136_v29, 1  ;;  %v675_v35 = vsel %vm170_vm3, %v674_v48, %v654_v53  ;;  %v570_v56 = vsel %vm179_vm6, %v569_v50, %v568_v54 }
 0x2fc   :  { %v676_v0 = vrot.slane %v656_v39, 6  ;;  %v691_v1 = vld [vmem:[#allocation7 + $0x6] sm:$0x1]  ;;  %v729_v2 = vld [vmem:[#allocation7 + $0xf] sm:$0x1]  ;;  %v571_v5 = vrot.slane %v548_v40, 3  ;;  %v640_v12 = vsel %vm173_vm4, %v639_v52, %v638_v58  ;;  %v605_v15 = vsel %vm176_vm5, %v604_v55, %v603_v32 }
 0x2fd   :  { %v549_v4 = vld [vmem:[#allocation7 + $0x32] sm:$0x1]  ;;  %v621_v6 = vld [vmem:[#allocation7 + $0x24] sm:$0x1]  ;;  %v641_v7 = vrot.slane %v620_v51, 5  ;;  %v606_v11 = vrot.slane %v584_v46, 4  ;;  %v712_v18 = vsel %vm170_vm3, %v711_v61, %v691_v1  ;;  %v500_v50 = vsel %vm185_vm8, %v499_v57, %v498_v22 }
 0x2fe   :  { %v1156_v8 = vld [vmem:[#allocation7 + $0x3a] sm:$0x1]  ;;  %v585_v10 = vld [vmem:[#allocation7 + $0x2b] sm:$0x1]  ;;  %v694_v13 = vld [vmem:[#allocation7 + $0x1e] sm:$0x1]  ;;  %v677_v26 = vsel %vm173_vm4, %v676_v0, %v675_v35  ;;  %v572_v28 = vsel %vm182_vm7, %v571_v5, %v570_v56 }
 0x2ff   :  { %v713_v14 = vrot.slane %v693_v60, 6  ;;  %v658_v16 = vld [vmem:[#allocation7 + $0x25] sm:$0x1]  ;;  %v678_v17 = vrot.slane %v657_v59, 5  ;;  %v730_v19 = vld [vmem:[#allocation7 + $0x17] sm:$0x1]  ;;  %v642_v33 = vsel %vm176_vm5, %v641_v7, %v640_v12  ;;  %v607_v40 = vsel %vm179_vm6, %v606_v11, %v605_v15 }
 0x300   :  { %v748_v21 = vrot.slane %v729_v2, 7  ;;  %v573_v23 = vrot.slane %v549_v4, 2  ;;  %v622_v24 = vld [vmem:[#allocation7 + $0x2c] sm:$0x1]  ;;  %v643_v25 = vrot.slane %v621_v6, 4  ;;  %v608_v31 = vrot.slane %v585_v10, 3 }
 0x301   :  { %v728_v27 = vld [vmem:[#allocation7 + $0x7] sm:$0x1]  ;;  %v586_v30 = vld [vmem:[#allocation7 + $0x33] sm:$0x1]  ;;  %v695_v34 = vld [vmem:[#allocation7 + $0x26] sm:$0x1]  ;;  %v714_v38 = vsel %vm173_vm4, %v713_v14, %v712_v18  ;;  %v679_v48 = vsel %vm176_vm5, %v678_v17, %v677_v26  ;;  %v502_v4 = vsel %vm188_vm9, %v501_v63, %v500_v50 }
 0x302   :  { %v715_v37 = vrot.slane %v694_v13, 5  ;;  %v659_v41 = vld [vmem:[#allocation7 + $0x2d] sm:$0x1]  ;;  %v680_v42 = vrot.slane %v658_v16, 4  ;;  %v731_v43 = vld [vmem:[#allocation7 + $0x1f] sm:$0x1]  ;;  %v749_v49 = vsel %vm170_vm3, %v748_v21, %v728_v27  ;;  %v644_v53 = vsel %vm179_vm6, %v643_v25, %v642_v33 }
 0x303   :  { %v750_v44 = vrot.slane %v730_v19, 6  ;;  %v575_v45 = vrot.slane %v1156_v8, 1  ;;  %v623_v47 = vld [vmem:[#allocation7 + $0x34] sm:$0x1]  ;;  %v645_v39 = vrot.slane %v622_v24, 3  ;;  %v610_v52 = vrot.slane %v586_v30, 2 }
 0x304   :  { %v587_v51 = vld [vmem:[#allocation7 + $0x3b] sm:$0x1]  ;;  %v696_v54 = vld [vmem:[#allocation7 + $0x2e] sm:$0x1]  ;;  %v717_v55 = vrot.slane %v695_v34, 4  ;;  %v609_v58 = vsel %vm182_vm7, %v608_v31, %v607_v40  ;;  %v682_v60 = vrot.slane %v659_v41, 3  ;;  %v716_v61 = vsel %vm176_vm5, %v715_v37, %v714_v38 }
 0x305   :  { %v660_v59 = vld [vmem:[#allocation7 + $0x35] sm:$0x1]  ;;  %v732_v32 = vld [vmem:[#allocation7 + $0x27] sm:$0x1]  ;;  %v752_v0 = vrot.slane %v731_v43, 5  ;;  %v574_v1 = vsel %vm185_vm8, %v573_v23, %v572_v28  ;;  %v647_v20 = vrot.slane %v623_v47, 2  ;;  %v681_v57 = vsel %vm179_vm6, %v680_v42, %v679_v48 }
 0x306   :  { %v624_v2 = vld [vmem:[#allocation7 + $0x3c] sm:$0x1]  ;;  %v751_v3 = vsel %vm173_vm4, %v750_v44, %v749_v49  ;;  %v612_v6 = vrot.slane %v587_v51, 1  ;;  %v646_v7 = vsel %vm182_vm7, %v645_v39, %v644_v53  ;;  %v697_v35 = vld [vmem:[#allocation7 + $0x36] sm:$0x1]  ;;  %v719_v8 = vrot.slane %v696_v54, 3 }
 0x307   :  { %v611_v56 = vsel %vm185_vm8, %v610_v52, %v609_v58  ;;  %v661_v11 = vld [vmem:[#allocation7 + $0x3d] sm:$0x1]  ;;  %v684_v12 = vrot.slane %v660_v59, 2  ;;  %v718_v13 = vsel %vm179_vm6, %v717_v55, %v716_v61  ;;  %v733_v14 = vld [vmem:[#allocation7 + $0x2f] sm:$0x1]  ;;  %v754_v15 = vrot.slane %v732_v32, 4 }
 0x308   :  { %v576_v16 = vsel %vm188_vm9, %v575_v45, %v574_v1  ;;  %v649_v29 = vrot.slane %v624_v2, 1  ;;  %v683_v63 = vsel %vm182_vm7, %v682_v60, %v681_v57  ;;  %v753_v17 = vsel %vm176_vm5, %v752_v0, %v751_v3  ;;  %v698_v22 = vld [vmem:[#allocation7 + $0x3e] sm:$0x1]  ;;  %v734_v27 = vld [vmem:[#allocation7 + $0x37] sm:$0x1]  ;;  %s772_s13 = sshll.u32 %s978_s5, 4  ;;  %s773_s13 = int_to_ptr.vmem [resolvable:$true] %s772_s13 }
 0x309   :  { %v648_v21 = vsel %vm185_vm8, %v647_v20, %v646_v7  ;;  %v721_v23 = vrot.slane %v697_v35, 2  ;;  %v613_v24 = vsel %vm188_vm9, %v612_v6, %v611_v56  ;;  %v686_v25 = vrot.slane %v661_v11, 1  ;;  %v735_v42 = vld [vmem:[#allocation7 + $0x3f] sm:$0x1]  ;;  %s934_s14 = scalar_lea.vmem %s773_s13, 128  ;;  %p939_p7 = scmp.lt.s32.totalorder %s773_s13, %s773_s13 }
 0x30a   :  { %v720_v26 = vsel %vm182_vm7, %v719_v8, %v718_v13  ;;  %v756_v28 = vrot.slane %v733_v14, 3  ;;  %v685_v31 = vsel %vm185_vm8, %v684_v12, %v683_v63  ;;  %v755_v33 = vsel %vm179_vm6, %v754_v15, %v753_v17  ;;  %p935_p6 = scmp.ne.s32.totalorder %s773_s13, %s934_s14  ;;  %p940_p8 = scmp.lt.s32.totalorder %s934_s14, %s934_s14 }
 0x30b   :  { %v723_v34 = vrot.slane %v698_v22, 1  ;;  %v722_v41 = vsel %vm185_vm8, %v721_v23, %v720_v26  ;;  %v758_v38 = vrot.slane %v734_v27, 2  ;;  %v687_v43 = vsel %vm188_vm9, %v686_v25, %v685_v31 }
 0x30c   :  { %v757_v44 = vsel %vm182_vm7, %v756_v28, %v755_v33  ;;  %v760_v39 = vrot.slane %v735_v42, 1  ;;  %p941_p9 = por %p940_p8, %p939_p7 }
 0x30d   :  { %v724_v47 = vsel %vm188_vm9, %v723_v34, %v722_v41  ;;  %v759_v51 = vsel %vm185_vm8, %v758_v38, %v757_v44 }
 0x30e   :  { %v761_v53 = vsel %vm188_vm9, %v760_v39, %v759_v51  ;;  %p942_p10 = pnand %p941_p9, %p935_p6 }
 0x346   :  { %v1142_v36 = vpop.permute.xlu1 %515  ;;  %v479_v5 = vpop.permute.xlu0 %478 }
 0x347   :  { %v541_v18 = vmul.f32 %v1150_v62, %v1142_v36  ;;  %v504_v19 = vmul.f32 %v502_v4, %v479_v5  ;;  %v650_v36 = vsel %vm188_vm9, %v649_v29, %v648_v21 }
 0x349   :  { %v542_v37 = vadd.f32 %v541_v18, %v504_v19 }
 0x34b   :  { %v1159_v9 = vpop.permute.xlu1 %552 }
 0x34c   :  { %v578_v30 = vmul.f32 %v576_v16, %v1159_v9 }
 0x34e   :  { %v579_v45 = vadd.f32 %v578_v30, %v542_v37 }
 0x350   :  { %v590_v46 = vpop.permute.xlu1 %589 }
 0x351   :  { %v615_v40 = vmul.f32 %v613_v24, %v590_v46 }
 0x353   :  { %v616_v48 = vadd.f32 %v615_v40, %v579_v45 }
 0x355   :  { %v627_v10 = vpop.permute.xlu1 %626 }
 0x356   :  { %v652_v9 = vmul.f32 %v650_v36, %v627_v10 }
 0x358   :  { %v653_v52 = vadd.f32 %v652_v9, %v616_v48 }
 0x35a   :  { %v664_v62 = vpop.permute.xlu1 %663 }
 0x35b   :  { %v689_v49 = vmul.f32 %v687_v43, %v664_v62 }
 0x35d   :  { %v690_v54 = vadd.f32 %v689_v49, %v653_v52 }
 0x35f   :  { %v701_v50 = vpop.permute.xlu1 %700 }
 0x360   :  { %v726_v46 = vmul.f32 %v724_v47, %v701_v50 }
 0x362   :  { %v727_v58 = vadd.f32 %v726_v46, %v690_v54 }
 0x364   :  { %v738_v55 = vpop.permute.xlu1 %737 }
 0x365   :  { %v763_v59 = vmul.f32 %v761_v53, %v738_v55 }
 0x367   :  { %v764_v60 = vadd.f32 %v763_v59, %v727_v58 }
 0x369   :  { %765 = vst.msk [vmem:[#allocation8] sm:$0xff] %vm192_vm10, %v764_v60 }
 0x36a   :  { %945 = shalt.err (!%p942_p10)
}
 0x36b   :  { %775 = dma.vmem_to_hbm [thread:$0]  %s773_s13, 128, %s1214_s4, [#allocation4]  }
 0x36c   :  { %958 = dma.done.wait [#allocation4], 128  }
 0x36d   :  { %959 = vsyncadd [#allocation4], 4294967168 }
 0x36e   :  { %960 = dma.done.wait [#allocation10], 128  }
 0x36f   :  { %961 = vsyncadd [#allocation10], 4294967168 }
 0x370   :  { %792 = vsyncpa [#allocation3], 1 }
 0x371   :  { %793 = vsyncpa [#allocation6], 1 }
 0x372   :  { %794 = vsyncpa [#allocation4], 1 }
 0x373   :  { %795 = vsyncpa [#allocation10], 1 }

</bundles_post_ra>
